<compile_context>
chip_gen: v6e
topology: v6e:2x2x1
jax: 0.10.0
libtpu: 0.0.40
codegen_flags: <defaults>
</compile_context>

<pallas_src>
import functools

import jax
import jax.numpy as jnp
import numpy as np
from jax.experimental import pallas as pl
from jax.experimental.pallas import tpu as pltpu

# ---- module configuration (deterministic, in-script) -----------------------
USE_TARGET_WEIGHT = True
OFFSET_WEIGHT = 1.0
USE_PIXEL_HM = True
USE_PRED_MASK = False
USE_GT_MASK = False
ALPHA = 2.0   # unused on this forward path
BETA = 0.1
GAMA = 1.0    # unused on this forward path
SMOOTH_L1 = True
# TODO(synk): the `bce` flag and gmm_mask() (host-side sklearn GMM fit on numpy)
# are not used by forward(); they are not implemented here.


def _joints_offset_kernel(hp_ref, hg_ref, m01_ref, op_ref, og_ref, tw_ref,
                          sq_ref, sl1_ref, *,
                          beta, use_target_weight, use_pixel_hm, smooth_l1):
    f32 = jnp.float32
    rt, hw = hp_ref.shape

    # Native-dtype loads, in-register cast to f32.
    hp = hp_ref[...].astype(f32)          # (RT, HW)
    hg = hg_ref[...].astype(f32)          # (RT, HW)

    if use_target_weight:
        # target_weight is grid-resident; slice this step's rows out of VMEM.
        row0 = pl.multiple_of(pl.program_id(0) * rt, 8)
        tw = tw_ref[pl.ds(row0, rt), :].astype(f32)      # (RT, 1)

    # ---- heatmap (MSE) path -------------------------------------------------
    d_h = hp - hg
    if use_pixel_hm:
        # _focal_pixel_weight: where(gt >= 0.3, exp(4*|pred-gt|), beta)
        mask_hm = jnp.where(hg >= 0.3, jnp.exp(4.0 * jnp.abs(d_h)), f32(beta))
        d_h = d_h * mask_hm               # (a*m - b*m) == (a-b)*m
    if use_target_weight:
        d_h = d_h * tw
    # Per-step partial: reduce over the sublane (row) axis only (VPU adds,
    # lane-dense >=128-wide output -> unmasked vst).
    sq_ref[...] = jnp.sum(d_h * d_h, axis=0, keepdims=True)[None]     # (1,1,HW)

    # ---- offset (SmoothL1 / L1) path ----------------------------------------
    m = m01_ref[...].astype(f32)          # (RT, HW)  mask_om (== mask_01 here)
    if use_target_weight:
        m = m * tw                        # combined per-element weight
    d_ox = (op_ref[:, :hw].astype(f32) - og_ref[:, :hw].astype(f32)) * m
    d_oy = (op_ref[:, hw:].astype(f32) - og_ref[:, hw:].astype(f32)) * m

    if smooth_l1:
        def crit(x):
            ax = jnp.abs(x)
            return jnp.where(ax < 1.0, 0.5 * x * x, ax - 0.5)
    else:
        def crit(x):
            return jnp.abs(x)

    sl1_ref[...] = jnp.sum(crit(d_ox) + crit(d_oy), axis=0, keepdims=True)[None]


def _pick_row_tile(n_rows, hw, in_itemsize, budget_bytes=10 << 20, min_steps=2):
    """Pick a row tile (multiple of 8) and the padded row count.

    The per-row working set counts the double-buffered native-dtype input
    windows (7 HW-wide streams) AND the ~8 HW-wide f32 temporaries the body
    materializes, so the budget is honest about scoped VMEM."""
    per_row = 2 * 7 * hw * int(in_itemsize) + 8 * hw * 4
    max_rt = max(8, (int(budget_bytes) // per_row) // 8 * 8)
    # Keep at least `min_steps` grid steps when the row count allows
    # (v7x has 2 TensorCores; the grid axis is "parallel").
    if n_rows >= 8 * min_steps:
        max_rt = min(max_rt, max(8, (n_rows // min_steps) // 8 * 8))
    # Prefer the largest multiple-of-8 divisor of n_rows within the cap
    # (exact tiling, no padding).
    best = 0
    rt = 8
    while rt <= min(max_rt, n_rows):
        if n_rows % rt == 0:
            best = rt
        rt += 8
    if best:
        return best, n_rows
    # Fallback: pad rows up to a multiple of a cap-sized tile.  Padded rows are
    # all-zero and contribute exactly 0 to both sums, so this is loss-neutral
    # and never silently blows the VMEM budget.
    rt = min(max_rt, max(8, -(-n_rows // 8) * 8))
    n_pad = -(-n_rows // rt) * rt
    return rt, n_pad


def joints_offset_loss(output, hm_hps, target, target_offset,
                       mask_01, mask_g, target_weight):
    """Returns (loss / num_joints, offset_loss / num_joints) like the module."""
    del mask_g  # pred_mask=False, gt_mask=False -> mask_om = mask_01
    B, J, H, W = output.shape
    HW = H * W
    R = B * J

    # Free, contiguity-preserving views of the natural NCHW layout.
    hp = output.reshape(R, HW)
    hg = target.reshape(R, HW)
    m01 = mask_01.reshape(R, HW)
    op = hm_hps.reshape(R, 2, HW)          # row (b, j): [x-offset | y-offset]
    og = target_offset.reshape(R, 2, HW)
    tw = target_weight.reshape(R, 1)

    # Lane-align HW to 128 (zero padding is loss-neutral; only done if needed).
    HW_pad = -(-HW // 128) * 128
    if HW_pad != HW:
        pad2 = ((0, 0), (0, HW_pad - HW))
        pad3 = ((0, 0), (0, 0), (0, HW_pad - HW))
        hp = jnp.pad(hp, pad2)
        hg = jnp.pad(hg, pad2)
        m01 = jnp.pad(m01, pad2)
        op = jnp.pad(op, pad3)
        og = jnp.pad(og, pad3)
    op = op.reshape(R, 2 * HW_pad)
    og = og.reshape(R, 2 * HW_pad)

    RT, R_pad = _pick_row_tile(R, HW_pad, output.dtype.itemsize)
    if R_pad != R:
        padr = ((0, R_pad - R), (0, 0))
        hp = jnp.pad(hp, padr)
        hg = jnp.pad(hg, padr)
        m01 = jnp.pad(m01, padr)
        op = jnp.pad(op, padr)
        og = jnp.pad(og, padr)
        tw = jnp.pad(tw, padr)
    G = R_pad // RT

    kernel = functools.partial(
        _joints_offset_kernel,
        beta=BETA,
        use_target_weight=USE_TARGET_WEIGHT,
        use_pixel_hm=USE_PIXEL_HM,
        smooth_l1=SMOOTH_L1,
    )

    sq_p, sl1_p = pl.pallas_call(
        kernel,
        out_shape=(jax.ShapeDtypeStruct((G, 1, HW_pad), jnp.float32),
                   jax.ShapeDtypeStruct((G, 1, HW_pad), jnp.float32)),
        grid=(G,),
        in_specs=[
            pl.BlockSpec((RT, HW_pad), lambda g: (g, 0)),
            pl.BlockSpec((RT, HW_pad), lambda g: (g, 0)),
            pl.BlockSpec((RT, HW_pad), lambda g: (g, 0)),
            pl.BlockSpec((RT, 2 * HW_pad), lambda g: (g, 0)),
            pl.BlockSpec((RT, 2 * HW_pad), lambda g: (g, 0)),
            pl.BlockSpec((R_pad, 1), lambda g: (0, 0)),   # grid-resident tw
        ],
        out_specs=(
            pl.BlockSpec((1, 1, HW_pad), lambda g: (g, 0, 0)),
            pl.BlockSpec((1, 1, HW_pad), lambda g: (g, 0, 0)),
        ),
        compiler_params=pltpu.CompilerParams(
            dimension_semantics=("parallel",),
            vmem_limit_bytes=32 * 1024 * 1024),
    )(hp, hg, m01, op, og, tw)

    # Tiny final reduction + normalization (all per-joint means share the same
    # element counts, so the summed means equal the summed numerators / count;
    # padded rows/lanes contribute exactly 0).
    sq_sum = jnp.sum(sq_p)
    sl1_sum = jnp.sum(sl1_p)
    joint_l2_loss = 0.5 * sq_sum / (B * HW)
    offset_loss = sl1_sum / (B * 2 * HW)
    loss = joint_l2_loss + OFFSET_WEIGHT * offset_loss
    return loss / J, offset_loss / J


def _reference(output, hm_hps, target, target_offset, mask_01, mask_g, target_weight):
    """Pure-JAX transliteration of the PyTorch forward for verification."""
    del mask_g
    B, J, H, W = output.shape
    HW = H * W
    hp = output.reshape(B, J, HW)
    hg = target.reshape(B, J, HW)
    op = hm_hps.reshape(B, J, 2, HW)
    og = target_offset.reshape(B, J, 2, HW)
    if USE_PIXEL_HM:
        ase = jnp.abs(output - target)
        mask_hm = jnp.where(target >= 0.3, jnp.exp(4.0 * ase), BETA).reshape(B, J, HW)
    else:
        mask_hm = jnp.ones((B, J, HW), jnp.float32)
    mask_om = mask_01.reshape(B, J, HW)

    joint_l2, off_loss = 0.0, 0.0
    for j in range(J):
        hpj = hp[:, j] * mask_hm[:, j]
        hgj = hg[:, j] * mask_hm[:, j]
        opj = op[:, j] * mask_om[:, j][:, None, :]
        ogj = og[:, j] * mask_om[:, j][:, None, :]
        twj = target_weight[:, j]                     # (B, 1)
        if USE_TARGET_WEIGHT:
            hpj = hpj * twj
            hgj = hgj * twj
            opj = opj * twj[:, :, None]
            ogj = ogj * twj[:, :, None]
        joint_l2 += 0.5 * jnp.mean((hpj - hgj) ** 2)
        d = opj - ogj
        ad = jnp.abs(d)
        if SMOOTH_L1:
            off_loss += jnp.mean(jnp.where(ad < 1.0, 0.5 * d * d, ad - 0.5))
        else:
            off_loss += jnp.mean(ad)
    loss = joint_l2 + OFFSET_WEIGHT * off_loss
    return loss / J, off_loss / J


if __name__ == "__main__":
    key = jax.random.PRNGKey(0)
    B, J, H, W = 2, 4, 16, 16
    ks = jax.random.split(key, 7)
    output = jax.random.uniform(ks[0], (B, J, H, W), jnp.float32)
    hm_hps = 0.5 * jax.random.normal(ks[1], (B, 2 * J, H, W), jnp.float32)
    target = jax.random.uniform(ks[2], (B, J, H, W), jnp.float32)
    target_offset = 0.5 * jax.random.normal(ks[3], (B, 2 * J, H, W), jnp.float32)
    mask_01 = (jax.random.uniform(ks[4], (B, J, H, W)) > 0.5).astype(jnp.float32)
    mask_g = jax.random.uniform(ks[5], (B, J, H, W), jnp.float32)
    target_weight = (jax.random.uniform(ks[6], (B, J, 1)) > 0.3).astype(jnp.float32)

    # f32 path, checked tightly against the pure-JAX reference.
    loss, off_loss = joints_offset_loss(output, hm_hps, target, target_offset,
                                        mask_01, mask_g, target_weight)
    loss, off_loss = jax.block_until_ready((loss, off_loss))

    ref_loss, ref_off = _reference(output, hm_hps, target, target_offset,
                                   mask_01, mask_g, target_weight)
    np.testing.assert_allclose(np.asarray(loss), np.asarray(ref_loss),
                               rtol=1e-5, atol=1e-5)
    np.testing.assert_allclose(np.asarray(off_loss), np.asarray(ref_off),
                               rtol=1e-5, atol=1e-5)

    # bf16 streaming path (halves HBM bytes on this bandwidth-bound kernel);
    # loose tolerance since inputs are rounded to bf16.
    bf = jnp.bfloat16
    loss16, off16 = joints_offset_loss(
        output.astype(bf), hm_hps.astype(bf), target.astype(bf),
        target_offset.astype(bf), mask_01.astype(bf), mask_g,
        target_weight.astype(bf))
    loss16, off16 = jax.block_until_ready((loss16, off16))
    np.testing.assert_allclose(np.asarray(loss16), np.asarray(ref_loss),
                               rtol=1e-1, atol=1e-3)
    np.testing.assert_allclose(np.asarray(off16), np.asarray(ref_off),
                               rtol=1e-1, atol=1e-3)

    print("KERNEL_OK")
</pallas_src>

<mosaic_0001>
module attributes {stable_mosaic.version = 11 : i64} {
  func.func @_joints_offset_kernel(%arg0: i32, %arg1: memref<8x256xf32, #tpu.memory_space<vmem>>, %arg2: memref<8x256xf32, #tpu.memory_space<vmem>>, %arg3: memref<8x256xf32, #tpu.memory_space<vmem>>, %arg4: memref<8x512xf32, #tpu.memory_space<vmem>>, %arg5: memref<8x512xf32, #tpu.memory_space<vmem>>, %arg6: memref<8x1xf32, #tpu.memory_space<vmem>>, %arg7: memref<1x1x256xf32, #tpu.memory_space<vmem>>, %arg8: memref<1x1x256xf32, #tpu.memory_space<vmem>>) attributes {dimension_semantics = [#tpu.dimension_semantics<parallel>], iteration_bounds = array<i64: 1>, scalar_prefetch = 0 : i64, scratch_operands = 0 : i64, tpu.core_type = #tpu.core_type<tc>, window_params = [{transform_indices = @transform_0, window_bounds = array<i64: 8, 256>}, {transform_indices = @transform_1, window_bounds = array<i64: 8, 256>}, {transform_indices = @transform_2, window_bounds = array<i64: 8, 256>}, {transform_indices = @transform_3, window_bounds = array<i64: 8, 512>}, {transform_indices = @transform_4, window_bounds = array<i64: 8, 512>}, {pipeline_mode = #tpu.pipeline_mode<synchronous>, transform_indices = @transform_5, window_bounds = array<i64: 8, 1>}, {transform_indices = @transform_6, window_bounds = array<i64: 1, 1, 256>}, {transform_indices = @transform_7, window_bounds = array<i64: 1, 1, 256>}]} {
    %c0 = arith.constant 0 : index
    %c0_0 = arith.constant 0 : index
    %0 = vector.load %arg1[%c0, %c0_0] : memref<8x256xf32, #tpu.memory_space<vmem>>, vector<8x256xf32>
    %c0_1 = arith.constant 0 : index
    %c0_2 = arith.constant 0 : index
    %1 = vector.load %arg2[%c0_1, %c0_2] : memref<8x256xf32, #tpu.memory_space<vmem>>, vector<8x256xf32>
    %c8_i32 = arith.constant 8 : i32
    %2 = arith.muli %arg0, %c8_i32 : i32
    %3 = tpu.assume_multiple %2, 8 : i32
    %4 = arith.index_cast %3 : i32 to index
    %c0_3 = arith.constant 0 : index
    %5 = vector.load %arg6[%4, %c0_3] : memref<8x1xf32, #tpu.memory_space<vmem>>, vector<8x1xf32>
    %6 = arith.subf %0, %1 : vector<8x256xf32>
    %cst = arith.constant 3.000000e-01 : f32
    %7 = vector.broadcast %cst : f32 to vector<8x256xf32>
    %8 = arith.cmpf oge, %1, %7 : vector<8x256xf32>
    %9 = math.absf %6 : vector<8x256xf32>
    %cst_4 = arith.constant 4.000000e+00 : f32
    %10 = vector.broadcast %cst_4 : f32 to vector<8x256xf32>
    %11 = arith.mulf %10, %9 : vector<8x256xf32>
    %12 = math.exp %11 : vector<8x256xf32>
    %cst_5 = arith.constant 1.000000e-01 : f32
    %13 = vector.broadcast %cst_5 : f32 to vector<8x256xf32>
    %14 = arith.select %8, %12, %13 : vector<8x256xi1>, vector<8x256xf32>
    %15 = arith.mulf %6, %14 : vector<8x256xf32>
    %16 = vector.broadcast %5 : vector<8x1xf32> to vector<8x256xf32>
    %17 = arith.mulf %15, %16 : vector<8x256xf32>
    %18 = arith.mulf %17, %17 : vector<8x256xf32>
    %cst_6 = arith.constant dense<0.000000e+00> : vector<256xf32>
    %19 = vector.multi_reduction <add>, %18, %cst_6 [0] : vector<8x256xf32> to vector<256xf32>
    %20 = vector.shape_cast %19 : vector<256xf32> to vector<1x256xf32>
    %21 = vector.shape_cast %20 : vector<1x256xf32> to vector<1x1x256xf32>
    %c0_7 = arith.constant 0 : index
    %c0_8 = arith.constant 0 : index
    %c0_9 = arith.constant 0 : index
    %22 = vector.load %arg7[%c0_7, %c0_8, %c0_9] : memref<1x1x256xf32, #tpu.memory_space<vmem>>, vector<1x1x256xf32>
    tpu.vector_store %arg7[%c0_7, %c0_8, %c0_9], %21 {strides = array<i32>} : memref<1x1x256xf32, #tpu.memory_space<vmem>>, vector<1x1x256xf32>,
    %c0_10 = arith.constant 0 : index
    %c0_11 = arith.constant 0 : index
    %23 = vector.load %arg3[%c0_10, %c0_11] : memref<8x256xf32, #tpu.memory_space<vmem>>, vector<8x256xf32>
    %24 = vector.broadcast %5 : vector<8x1xf32> to vector<8x256xf32>
    %25 = arith.mulf %23, %24 : vector<8x256xf32>
    %c0_12 = arith.constant 0 : index
    %c0_13 = arith.constant 0 : index
    %26 = vector.load %arg4[%c0_12, %c0_13] : memref<8x512xf32, #tpu.memory_space<vmem>>, vector<8x256xf32>
    %c0_14 = arith.constant 0 : index
    %c0_15 = arith.constant 0 : index
    %27 = vector.load %arg5[%c0_14, %c0_15] : memref<8x512xf32, #tpu.memory_space<vmem>>, vector<8x256xf32>
    %28 = arith.subf %26, %27 : vector<8x256xf32>
    %29 = arith.mulf %28, %25 : vector<8x256xf32>
    %c0_16 = arith.constant 0 : index
    %c256 = arith.constant 256 : index
    %30 = vector.load %arg4[%c0_16, %c256] : memref<8x512xf32, #tpu.memory_space<vmem>>, vector<8x256xf32>
    %c0_17 = arith.constant 0 : index
    %c256_18 = arith.constant 256 : index
    %31 = vector.load %arg5[%c0_17, %c256_18] : memref<8x512xf32, #tpu.memory_space<vmem>>, vector<8x256xf32>
    %32 = arith.subf %30, %31 : vector<8x256xf32>
    %33 = arith.mulf %32, %25 : vector<8x256xf32>
    %34 = math.absf %29 : vector<8x256xf32>
    %cst_19 = arith.constant 1.000000e+00 : f32
    %35 = vector.broadcast %cst_19 : f32 to vector<8x256xf32>
    %36 = arith.cmpf olt, %34, %35 : vector<8x256xf32>
    %cst_20 = arith.constant 5.000000e-01 : f32
    %37 = vector.broadcast %cst_20 : f32 to vector<8x256xf32>
    %38 = arith.mulf %37, %29 : vector<8x256xf32>
    %39 = arith.mulf %38, %29 : vector<8x256xf32>
    %cst_21 = arith.constant 5.000000e-01 : f32
    %40 = vector.broadcast %cst_21 : f32 to vector<8x256xf32>
    %41 = arith.subf %34, %40 : vector<8x256xf32>
    %42 = arith.select %36, %39, %41 : vector<8x256xi1>, vector<8x256xf32>
    %43 = math.absf %33 : vector<8x256xf32>
    %cst_22 = arith.constant 1.000000e+00 : f32
    %44 = vector.broadcast %cst_22 : f32 to vector<8x256xf32>
    %45 = arith.cmpf olt, %43, %44 : vector<8x256xf32>
    %cst_23 = arith.constant 5.000000e-01 : f32
    %46 = vector.broadcast %cst_23 : f32 to vector<8x256xf32>
    %47 = arith.mulf %46, %33 : vector<8x256xf32>
    %48 = arith.mulf %47, %33 : vector<8x256xf32>
    %cst_24 = arith.constant 5.000000e-01 : f32
    %49 = vector.broadcast %cst_24 : f32 to vector<8x256xf32>
    %50 = arith.subf %43, %49 : vector<8x256xf32>
    %51 = arith.select %45, %48, %50 : vector<8x256xi1>, vector<8x256xf32>
    %52 = arith.addf %42, %51 : vector<8x256xf32>
    %cst_25 = arith.constant dense<0.000000e+00> : vector<256xf32>
    %53 = vector.multi_reduction <add>, %52, %cst_25 [0] : vector<8x256xf32> to vector<256xf32>
    %54 = vector.shape_cast %53 : vector<256xf32> to vector<1x256xf32>
    %55 = vector.shape_cast %54 : vector<1x256xf32> to vector<1x1x256xf32>
    %c0_26 = arith.constant 0 : index
    %c0_27 = arith.constant 0 : index
    %c0_28 = arith.constant 0 : index
    %56 = vector.load %arg8[%c0_26, %c0_27, %c0_28] : memref<1x1x256xf32, #tpu.memory_space<vmem>>, vector<1x1x256xf32>
    tpu.vector_store %arg8[%c0_26, %c0_27, %c0_28], %55 {strides = array<i32>} : memref<1x1x256xf32, #tpu.memory_space<vmem>>, vector<1x1x256xf32>,
    return
  }
  func.func @transform_0(%arg0: i32) -> (i32, i32) {
    %c0_i32 = arith.constant 0 : i32
    %c0_i32_0 = arith.constant 0 : i32
    return %arg0, %c0_i32 : i32, i32
  }
  func.func @transform_1(%arg0: i32) -> (i32, i32) {
    %c0_i32 = arith.constant 0 : i32
    %c0_i32_0 = arith.constant 0 : i32
    return %arg0, %c0_i32 : i32, i32
  }
  func.func @transform_2(%arg0: i32) -> (i32, i32) {
    %c0_i32 = arith.constant 0 : i32
    %c0_i32_0 = arith.constant 0 : i32
    return %arg0, %c0_i32 : i32, i32
  }
  func.func @transform_3(%arg0: i32) -> (i32, i32) {
    %c0_i32 = arith.constant 0 : i32
    %c0_i32_0 = arith.constant 0 : i32
    return %arg0, %c0_i32 : i32, i32
  }
  func.func @transform_4(%arg0: i32) -> (i32, i32) {
    %c0_i32 = arith.constant 0 : i32
    %c0_i32_0 = arith.constant 0 : i32
    return %arg0, %c0_i32 : i32, i32
  }
  func.func @transform_5(%arg0: i32) -> (i32, i32) {
    %c0_i32 = arith.constant 0 : i32
    %c0_i32_0 = arith.constant 0 : i32
    %c0_i32_1 = arith.constant 0 : i32
    return %c0_i32, %c0_i32_0 : i32, i32
  }
  func.func @transform_6(%arg0: i32) -> (i32, i32, i32) {
    %c0_i32 = arith.constant 0 : i32
    %c0_i32_0 = arith.constant 0 : i32
    %c0_i32_1 = arith.constant 0 : i32
    return %arg0, %c0_i32, %c0_i32_0 : i32, i32, i32
  }
  func.func @transform_7(%arg0: i32) -> (i32, i32, i32) {
    %c0_i32 = arith.constant 0 : i32
    %c0_i32_0 = arith.constant 0 : i32
    %c0_i32_1 = arith.constant 0 : i32
    return %arg0, %c0_i32, %c0_i32_0 : i32, i32, i32
  }
}

</mosaic_0001>

<bundles_post_ra>
// kernel: tpu_custom_call.1
= control target key start
LH: loop header
LB: loop body
LE: loop exit
PB: predicated region body
PF: predicated region fallthrough
CT: control target
= control target key end

     0   :  { %13 = vsyncpa [#allocation3], 0  ;;  %s533_s0 = inlined_call_operand.hbm [shape: f32[8,256], index: 0, kind: input, shape index: {}]   ;;  %s534_s1 = inlined_call_operand.hbm [shape: f32[8,256], index: 1, kind: input, shape index: {}]   ;;  %s535_s2 = inlined_call_operand.hbm [shape: f32[8,256], index: 2, kind: input, shape index: {}]   ;;  %s536_s3 = inlined_call_operand.hbm [shape: f32[8,512], index: 3, kind: input, shape index: {}]   ;;  %s537_s4 = inlined_call_operand.hbm [shape: f32[8,512], index: 4, kind: input, shape index: {}]   ;;  %s538_s5 = inlined_call_operand.vmem [shape: f32[8,1], index: 5, kind: input, shape index: {}]   ;;  %s539_s6 = inlined_call_operand.hbm [shape: f32[1,1,256], index: 6, kind: output, shape index: {0}]   ;;  %s540_s7 = inlined_call_operand.hbm [shape: f32[1,1,256], index: 7, kind: output, shape index: {1}]  }
   0x1   :  { %14 = vsyncpa [#allocation6], 0 }
   0x2   :  { %15 = vsyncpa [#allocation9], 0 }
   0x3   :  { %16 = vsyncpa [#allocation4], 0 }
   0x4   :  { %17 = vsyncpa [#allocation13], 0  ;;  %s428_s24 = smov [#allocation5]   ;;  %s429_s26 = smov [#allocation8]  }
   0x5   :  { %s34_s25 = sshll.u32 %s428_s24, 4  ;;  %s54_s27 = sshll.u32 %s429_s26, 4  ;;  %s35_s25 = int_to_ptr.vmem [resolvable:$true] %s34_s25  ;;  %s55_s27 = int_to_ptr.vmem [resolvable:$true] %s54_s27 }
   0x6   :  { %s286_s28 = scalar_lea.vmem %s35_s25, 256  ;;  %p291_p1 = scmp.lt.s32.totalorder %s35_s25, %s35_s25 }
   0x7   :  { %p287_p0 = scmp.ne.s32.totalorder %s35_s25, %s286_s28  ;;  %p292_p2 = scmp.lt.s32.totalorder %s286_s28, %s286_s28 }
   0x9   :  { %p293_p3 = por %p292_p2, %p291_p1 }
   0xb   :  { %p294_p4 = pnand %p293_p3, %p287_p0 }
   0xd   :  { %297 = shalt.err (!%p294_p4)
}
   0xe   :  { %37 = dma.hbm_to_vmem [thread:$0]  %s534_s1, 256, %s35_s25, [#allocation6]  }
   0xf   :  { %s306_s8 = scalar_lea.vmem %s55_s27, 512  ;;  %p311_p6 = scmp.lt.s32.totalorder %s55_s27, %s55_s27 }
  0x10   :  { %p307_p5 = scmp.ne.s32.totalorder %s55_s27, %s306_s8  ;;  %p312_p7 = scmp.lt.s32.totalorder %s306_s8, %s306_s8 }
  0x12   :  { %p313_p8 = por %p312_p7, %p311_p6 }
  0x14   :  { %p314_p9 = pnand %p313_p8, %p307_p5 }
  0x16   :  { %317 = shalt.err (!%p314_p9)
}
  0x17   :  { %57 = dma.hbm_to_vmem [thread:$0]  %s536_s3, 512, %s55_s27, [#allocation9]  }
  0x18   :  { %s430_s11 = smov [#allocation2]   ;;  %s431_s13 = smov [#allocation7]  }
  0x19   :  { %s24_s12 = sshll.u32 %s430_s11, 4  ;;  %s44_s14 = sshll.u32 %s431_s13, 4  ;;  %s25_s12 = int_to_ptr.vmem [resolvable:$true] %s24_s12  ;;  %s45_s14 = int_to_ptr.vmem [resolvable:$true] %s44_s14 }
  0x1a   :  { %s326_s15 = scalar_lea.vmem %s25_s12, 256  ;;  %p331_p11 = scmp.lt.s32.totalorder %s25_s12, %s25_s12 }
  0x1b   :  { %p327_p10 = scmp.ne.s32.totalorder %s25_s12, %s326_s15  ;;  %p332_p12 = scmp.lt.s32.totalorder %s326_s15, %s326_s15 }
  0x1d   :  { %p333_p13 = por %p332_p12, %p331_p11 }
  0x1f   :  { %p334_p0 = pnand %p333_p13, %p327_p10 }
  0x21   :  { %337 = shalt.err (!%p334_p0)
}
  0x22   :  { %27 = dma.hbm_to_vmem [thread:$0]  %s533_s0, 256, %s25_s12, [#allocation3]  }
  0x23   :  { %s346_s17 = scalar_lea.vmem %s45_s14, 256  ;;  %p351_p2 = scmp.lt.s32.totalorder %s45_s14, %s45_s14 }
  0x24   :  { %p347_p1 = scmp.ne.s32.totalorder %s45_s14, %s346_s17  ;;  %p352_p3 = scmp.lt.s32.totalorder %s346_s17, %s346_s17 }
  0x26   :  { %p353_p4 = por %p352_p3, %p351_p2 }
  0x28   :  { %p354_p5 = pnand %p353_p4, %p347_p1 }
  0x2a   :  { %357 = shalt.err (!%p354_p5)
}
  0x2b   :  { %47 = dma.hbm_to_vmem [thread:$0]  %s535_s2, 256, %s45_s14, [#allocation6]  }
  0x2c   :  { %s432_s19 = smov [#allocation10]  }
  0x2d   :  { %s64_s20 = sshll.u32 %s432_s19, 4  ;;  %s65_s20 = int_to_ptr.vmem [resolvable:$true] %s64_s20 }
  0x2e   :  { %s366_s21 = scalar_lea.vmem %s65_s20, 512  ;;  %p371_p7 = scmp.lt.s32.totalorder %s65_s20, %s65_s20 }
  0x2f   :  { %p367_p6 = scmp.ne.s32.totalorder %s65_s20, %s366_s21  ;;  %p372_p8 = scmp.lt.s32.totalorder %s366_s21, %s366_s21 }
  0x31   :  { %p373_p9 = por %p372_p8, %p371_p7 }
  0x33   :  { %p374_p10 = pnand %p373_p9, %p367_p6 }
  0x35   :  { %377 = shalt.err (!%p374_p10)
}
  0x36   :  { %67 = dma.hbm_to_vmem [thread:$0]  %s537_s4, 512, %s65_s20, [#allocation9]  }
  0x37   :  { %418 = dma.done.wait [#allocation3], 256  }
  0x38   :  { %419 = vsyncadd [#allocation3], 4294967040 }
  0x39   :  { %420 = dma.done.wait [#allocation6], 512  }
  0x3a   :  { %421 = vsyncadd [#allocation6], 4294966784 }
  0x3b   :  { %422 = dma.done.wait [#allocation9], 1024  }
  0x3c   :  { %423 = vsyncadd [#allocation9], 4294966272  ;;  %v433_v0 = vmov 0   ;;  %v91_v1 = vld [vmem:[%s538_s5] sm:$0xff]  ;;  %v87_v3 = vld [vmem:[#allocation5] sm:$0xff]  ;;  %v135_v41 = vlaneseq  ;;  %s435_s4 = smov [#allocation11]  }
  0x3d   :  { %273 = vset.pattern.permute.xlu0 %v433_v0  ;;  %v85_v2 = vld [vmem:[#allocation2] sm:$0xff]  ;;  %v86_v4 = vld [vmem:[#allocation2 + $0x8] sm:$0xff]  ;;  %v88_v5 = vld [vmem:[#allocation5 + $0x8] sm:$0xff]  ;;  %vm94_vm0 = vcmp.ge.f32.partialorder %v87_v3, 0.3  ;;  %s235_s5 = sshll.u32 %s435_s4, 4  ;;  %s236_s5 = int_to_ptr.vmem [resolvable:$true] %s235_s5 }
  0x3e   :  { %110 = vperm.xlu0 %273, %v91_v1   ;;  %v92_v6 = vsub.f32 %v85_v2, %v87_v3  ;;  %v93_v7 = vsub.f32 %v86_v4, %v88_v5  ;;  %vm95_vm1 = vcmp.ge.f32.partialorder %v88_v5, 0.3  ;;  %v156_v18 = vld [vmem:[#allocation8] sm:$0xff]  ;;  %v157_v19 = vld [vmem:[#allocation8 + $0x8] sm:$0xff]  ;;  %v164_v22 = vld [vmem:[#allocation8 + $0x10] sm:$0xff]  ;;  %v136_v59 = vshrl.u32 %v135_v41, 7  ;;  %p383_p12 = scmp.lt.s32.totalorder %s236_s5, %s236_s5 }
  0x3f   :  { %v158_v20 = vld [vmem:[#allocation10] sm:$0xff]  ;;  %v159_v21 = vld [vmem:[#allocation10 + $0x8] sm:$0xff]  ;;  %v165_v23 = vld [vmem:[#allocation8 + $0x18] sm:$0xff]  ;;  %v434_v39 = vmov 1966171168   ;;  %vm519_vm6 = vcmp.lt.s32.totalorder %v135_v41, 256 }
  0x40   :  { %v96_v8 = vand.u32 2147483647, %v92_v6  ;;  %v97_v9 = vand.u32 2147483647, %v93_v7  ;;  %v166_v24 = vld [vmem:[#allocation10 + $0x10] sm:$0xff]  ;;  %v167_v25 = vld [vmem:[#allocation10 + $0x18] sm:$0xff]  ;;  %v160_v30 = vsub.f32 %v156_v18, %v158_v20  ;;  %v161_v31 = vsub.f32 %v157_v19, %v159_v21 }
  0x41   :  { %v152_v28 = vld [vmem:[#allocation7] sm:$0xff]  ;;  %v153_v29 = vld [vmem:[#allocation7 + $0x8] sm:$0xff]  ;;  %v168_v32 = vsub.f32 %v164_v22, %v166_v24  ;;  %v169_v33 = vsub.f32 %v165_v23, %v167_v25  ;;  %v133_v40 = vunpack.c.l.s4 %v434_v39  ;;  %s378_s24 = scalar_lea.vmem %s236_s5, 32 }
  0x42   :  { %v98_v10 = vmul.f32 4.0, %v96_v8  ;;  %v99_v11 = vmul.f32 4.0, %v97_v9  ;;  %p379_p11 = scmp.ne.s32.totalorder %s236_s5, %s378_s24  ;;  %p384_p13 = scmp.lt.s32.totalorder %s378_s24, %s378_s24 }
  0x43   :  { %v134_v58 = vunpack.c.0.s8 %v133_v40 }
  0x44   :  { %v100_v12 = vmul.f32 1.442695, %v98_v10  ;;  %v102_v13 = vmul.f32 1.442695, %v99_v11  ;;  %p385_p0 = por %p384_p13, %p383_p12 }
  0x45   :  { %v137_v20 = vsub.s32 %v134_v58, %v136_v59 }
  0x46   :  { %274 = vpow2.f32 %v100_v12  ;;  %p386_p1 = pnand %p385_p0, %p379_p11 }
  0x47   :  { %276 = vpow2.f32 %v102_v13 }
  0x53   :  { %v275_v14 = vpop.eup %274 }
  0x54   :  { %v277_v15 = vpop.eup %276  ;;  %v104_v16 = vsel %vm94_vm0, %v275_v14, 0.1 }
  0x55   :  { %v105_v17 = vsel %vm95_vm1, %v277_v15, 0.1  ;;  %v106_v26 = vmul.f32 %v104_v16, %v92_v6 }
  0x56   :  { %v107_v27 = vmul.f32 %v105_v17, %v93_v7 }
  0xb9   :  { %v111_v34 = vpop.permute.xlu0 %110 }
  0xba   :  { %v113_v35 = vmul.f32 %v111_v34, %v106_v26  ;;  %v114_v36 = vmul.f32 %v111_v34, %v107_v27  ;;  %v154_v37 = vmul.f32 %v152_v28, %v111_v34  ;;  %v155_v38 = vmul.f32 %v153_v29, %v111_v34 }
  0xbc   :  { %v115_v42 = vmul.f32 %v113_v35, %v113_v35  ;;  %v116_v43 = vmul.f32 %v114_v36, %v114_v36  ;;  %v162_v44 = vmul.f32 %v160_v30, %v154_v37  ;;  %v163_v45 = vmul.f32 %v161_v31, %v155_v38 }
  0xbd   :  { %v170_v46 = vmul.f32 %v168_v32, %v154_v37  ;;  %v171_v47 = vmul.f32 %v169_v33, %v155_v38 }
  0xbe   :  { %v117_v48 = vrot.slane %v115_v42, 4  ;;  %v123_v49 = vrot.slane %v116_v43, 4  ;;  %v172_v50 = vand.u32 2147483647, %v162_v44  ;;  %v173_v51 = vand.u32 2147483647, %v163_v45 }
  0xbf   :  { %v176_v52 = vmul.f32 0.5, %v162_v44  ;;  %v177_v53 = vmul.f32 0.5, %v163_v45  ;;  %v184_v54 = vand.u32 2147483647, %v170_v46  ;;  %v185_v55 = vand.u32 2147483647, %v171_v47 }
  0xc0   :  { %v118_v56 = vadd.f32 %v117_v48, %v115_v42  ;;  %v124_v57 = vadd.f32 %v123_v49, %v116_v43  ;;  %v260_v62 = vadd.f32 -0.5, %v172_v50  ;;  %v261_v63 = vadd.f32 -0.5, %v173_v51 }
  0xc1   :  { %v178_v60 = vmul.f32 %v176_v52, %v162_v44  ;;  %v179_v61 = vmul.f32 %v177_v53, %v163_v45  ;;  %vm495_vm2 = vcmp.lt.f32.partialorder %v172_v50, 1.0  ;;  %vm499_vm3 = vcmp.lt.f32.partialorder %v173_v51, 1.0 }
  0xc2   :  { %v119_v0 = vrot.slane %v118_v56, 2  ;;  %v125_v1 = vrot.slane %v124_v57, 2  ;;  %vm503_vm4 = vcmp.lt.f32.partialorder %v184_v54, 1.0  ;;  %vm507_vm5 = vcmp.lt.f32.partialorder %v185_v55, 1.0 }
  0xc3   :  { %v188_v6 = vmul.f32 0.5, %v170_v46  ;;  %v189_v7 = vmul.f32 0.5, %v171_v47  ;;  %v262_v10 = vadd.f32 -0.5, %v184_v54  ;;  %v263_v11 = vadd.f32 -0.5, %v185_v55 }
  0xc4   :  { %v120_v8 = vadd.f32 %v119_v0, %v118_v56  ;;  %v126_v9 = vadd.f32 %v125_v1, %v124_v57  ;;  %v182_v12 = vsel %vm495_vm2, %v178_v60, %v260_v62  ;;  %v183_v13 = vsel %vm499_vm3, %v179_v61, %v261_v63 }
  0xc5   :  { %v190_v14 = vmul.f32 %v188_v6, %v170_v46  ;;  %v191_v15 = vmul.f32 %v189_v7, %v171_v47 }
  0xc6   :  { %v121_v16 = vrot.slane %v120_v8, 1  ;;  %v127_v17 = vrot.slane %v126_v9, 1 }
  0xc7   :  { %v194_v18 = vsel %vm503_vm4, %v190_v14, %v262_v10  ;;  %v195_v19 = vsel %vm507_vm5, %v191_v15, %v263_v11 }
  0xc8   :  { %v122_v21 = vadd.f32 %v121_v16, %v120_v8  ;;  %v128_v22 = vadd.f32 %v127_v17, %v126_v9  ;;  %v196_v23 = vadd.f32 %v194_v18, %v182_v12  ;;  %v197_v24 = vadd.f32 %v195_v19, %v183_v13 }
  0xca   :  { %v198_v25 = vrot.slane %v196_v23, 4  ;;  %v204_v26 = vrot.slane %v197_v24, 4  ;;  %v131_v27 = vcombine.low %v122_v21, %v128_v22 }
  0xcc   :  { %v138_v28 = vrot.slane %v131_v27, %v137_v20  ;;  %v199_v29 = vadd.f32 %v198_v25, %v196_v23  ;;  %v205_v30 = vadd.f32 %v204_v26, %v197_v24 }
  0xce   :  { %v145_v32 = vrot.slane %v138_v28, %v137_v20  ;;  %v200_v33 = vrot.slane %v199_v29, 2  ;;  %v206_v34 = vrot.slane %v205_v30, 2 }
  0xd0   :  { %151 = vst.msk [vmem:[#allocation11] sm:$0x3] %vm519_vm6, %v145_v32  ;;  %v201_v35 = vadd.f32 %v200_v33, %v199_v29  ;;  %v207_v36 = vadd.f32 %v206_v34, %v205_v30 }
  0xd1   :  { %389 = shalt.err (!%p386_p1)
}
  0xd2   :  { %238 = dma.vmem_to_hbm [thread:$0]  %s236_s5, 32, %s539_s6, [#allocation4]   ;;  %v202_v37 = vrot.slane %v201_v35, 1  ;;  %v208_v38 = vrot.slane %v207_v36, 1 }
  0xd3   :  { %s436_s27 = smov [#allocation12]  }
  0xd4   :  { %v203_v39 = vadd.f32 %v202_v37, %v201_v35  ;;  %v209_v40 = vadd.f32 %v208_v38, %v207_v36  ;;  %s245_s28 = sshll.u32 %s436_s27, 4  ;;  %s246_s28 = int_to_ptr.vmem [resolvable:$true] %s245_s28 }
  0xd5   :  { %s398_s29 = scalar_lea.vmem %s246_s28, 32  ;;  %p403_p3 = scmp.lt.s32.totalorder %s246_s28, %s246_s28 }
  0xd6   :  { %v212_v41 = vcombine.low %v203_v39, %v209_v40  ;;  %p399_p2 = scmp.ne.s32.totalorder %s246_s28, %s398_s29  ;;  %p404_p4 = scmp.lt.s32.totalorder %s398_s29, %s398_s29 }
  0xd8   :  { %v219_v42 = vrot.slane %v212_v41, %v137_v20  ;;  %p405_p5 = por %p404_p4, %p403_p3 }
  0xda   :  { %v226_v43 = vrot.slane %v219_v42, %v137_v20  ;;  %p406_p6 = pnand %p405_p5, %p399_p2 }
  0xdc   :  { %228 = vst.msk [vmem:[#allocation12] sm:$0x3] %vm519_vm6, %v226_v43 }
  0xdd   :  { %409 = shalt.err (!%p406_p6)
}
  0xde   :  { %248 = dma.vmem_to_hbm [thread:$0]  %s246_s28, 32, %s540_s7, [#allocation13]  }
  0xdf   :  { %424 = dma.done.wait [#allocation4], 32  }
  0xe0   :  { %425 = vsyncadd [#allocation4], 4294967264 }
  0xe1   :  { %426 = dma.done.wait [#allocation13], 32  }
  0xe2   :  { %427 = vsyncadd [#allocation13], 4294967264 }
  0xe3   :  { %255 = vsyncpa [#allocation3], 1 }
  0xe4   :  { %256 = vsyncpa [#allocation6], 1 }
  0xe5   :  { %257 = vsyncpa [#allocation9], 1 }
  0xe6   :  { %258 = vsyncpa [#allocation4], 1 }
  0xe7   :  { %259 = vsyncpa [#allocation13], 1 }

</bundles_post_ra>
